<compile_context>
chip_gen: v5e
topology: v5e:2x2
jax: 0.10.0
libtpu: 0.0.40
codegen_flags: <defaults>
</compile_context>

<pallas_src>
import functools

import jax
import jax.numpy as jnp
from jax.experimental import pallas as pl
from jax.experimental.pallas import tpu as pltpu


def _round_up(n, m):
    return (n + m - 1) // m * m


def _lane_pad(n):
    # Lane dims padded to 128 (vreg lane width); 256 for large dims so the
    # 2x256x256 MXUs on v6e/v7x see full-width tiles (v5e's 128-wide MXU is
    # already native at 128 and the extra padding would be pure overhead).
    return _round_up(n, 256 if n >= 512 else 128)


def prepare_params(w1, b1, w2, b2):
    """One-time parameter prep, hoisted out of the per-call hot path.

    Takes PyTorch-convention Linear parameters:
      base: w1 [H, F], b1 [H]       head: w2 [C, H], b2 [C]
    Returns transposed, zero-padded, bf16/f32 parameters plus (F, H, C).
    Zero padding is exact: padded hidden columns get w1=0, b1=0 -> ReLU(0)=0
    -> zero contribution through zero w2 rows; padded output columns are 0 and
    sliced off by the wrapper.
    """
    H, F = w1.shape
    C = w2.shape[0]
    Hp, Cp = _lane_pad(H), _lane_pad(C)

    def pad2(a, rows, cols, dtype):
        out = jnp.zeros((rows, cols), dtype=dtype)
        return out.at[: a.shape[0], : a.shape[1]].set(a.astype(dtype))

    w1p = pad2(w1.T, F, Hp, jnp.bfloat16)              # [F,  Hp]
    w2p = pad2(w2.T, Hp, Cp, jnp.bfloat16)             # [Hp, Cp]
    b1p = pad2(b1.reshape(1, -1), 1, Hp, jnp.float32)  # [1,  Hp]
    b2p = pad2(b2.reshape(1, -1), 1, Cp, jnp.float32)  # [1,  Cp]
    return w1p, b1p, w2p, b2p, (F, H, C)


def base_head_kernel(x_ref, w1_ref, b1_ref, w2_ref, b2_ref, o_ref):
    # base: Linear (bf16 operands into the MXU, f32 accumulate) + bias + ReLU.
    # x arrives in its original dtype; the cast to bf16 is cheap VPU filler
    # that hides under the MXU and avoids a padded-bf16 copy of x in HBM.
    x = x_ref[...].astype(jnp.bfloat16)
    h = jnp.dot(x, w1_ref[...], preferred_element_type=jnp.float32)
    h = jnp.maximum(h + b1_ref[...], 0.0)              # f32 epilogue (v5e-safe)
    # head: Linear; store directly in the final output dtype (halves writeback
    # and vst pressure vs an f32 slab + wrapper cast).
    o_ref[...] = (
        jnp.dot(h.astype(w2_ref.dtype), w2_ref[...],
                preferred_element_type=jnp.float32)
        + b2_ref[...]
    ).astype(o_ref.dtype)


@functools.partial(jax.jit, static_argnames=("tb", "single_buffer_weights"))
def _base_head_call(x, w1p, b1p, w2p, b2p, *, tb, single_buffer_weights):
    B, F = x.shape
    Fw, Hp = w1p.shape
    Cp = w2p.shape[1]
    assert Fw == F, (Fw, F)
    out_dtype = x.dtype

    # Batch tile: big tiles amortize the ~0.35us/grid-step overhead; a cdiv
    # grid lets Pallas mask the ragged last block (no batch padding, no wasted
    # padded-row DMA/MXU work).  Mid-size batches are split into >=2 steps so
    # the "parallel" axis can shard across v7x's two TensorCores.
    if B > tb:
        TB = tb
    elif B >= 128:
        TB = _round_up(pl.cdiv(B, 2), 8)
    else:
        TB = _round_up(B, 8)
    grid = (pl.cdiv(B, TB),)

    x_bytes = x.dtype.itemsize
    o_bytes = jnp.dtype(out_dtype).itemsize
    n_wbuf = 1 if single_buffer_weights else 2

    # Real VMEM footprint: resident (single-buffered) weights + double-buffered
    # activation tiles + f32 hidden intermediate.
    resident = n_wbuf * ((F * Hp + Hp * Cp) * 2 + (Hp + Cp) * 4)
    per_step = 2 * (TB * F * x_bytes + TB * Cp * o_bytes) + TB * Hp * 4
    vmem_need = resident + per_step
    if vmem_need > 48 * 1024 * 1024:
        # TODO(synk): add a K-grid axis over F with an f32 accumulator scratch
        # (pl.when init on k==0, finalize on last k, "arbitrary" semantics) so
        # large base layers don't blow v7x's 64 MiB VMEM.
        raise NotImplementedError("weights too large to hold VMEM-resident")
    # Leave headroom under v7x's 64 MiB physical VMEM.
    vmem_limit = min(max(vmem_need + (8 << 20), 16 << 20), 56 << 20)

    def const_spec(shape):
        # Weights/biases: constant block index -> DMA'd once, held resident.
        # Single-buffering them halves their VMEM footprint (they never
        # re-fetch, so the second pipeline buffer is pure waste).
        if single_buffer_weights:
            return pl.BlockSpec(shape, lambda b: (0, 0),
                                pipeline_mode=pl.Buffered(1))
        return pl.BlockSpec(shape, lambda b: (0, 0))

    cost = pl.CostEstimate(
        flops=2 * B * (F * Hp + Hp * Cp),
        transcendentals=0,
        bytes_accessed=(B * F * x_bytes + (F * Hp + Hp * Cp) * 2
                        + (Hp + Cp) * 4 + B * Cp * o_bytes),
    )

    return pl.pallas_call(
        base_head_kernel,
        out_shape=jax.ShapeDtypeStruct((B, Cp), out_dtype),
        grid_spec=pl.GridSpec(
            grid=grid,
            in_specs=[
                pl.BlockSpec((TB, F), lambda b: (b, 0)),   # activations: tiled
                const_spec((F, Hp)),                       # W1: VMEM-resident
                const_spec((1, Hp)),                       # b1
                const_spec((Hp, Cp)),                      # W2
                const_spec((1, Cp)),                       # b2
            ],
            out_specs=pl.BlockSpec((TB, Cp), lambda b: (b, 0)),
        ),
        compiler_params=pltpu.CompilerParams(
            # Batch steps are independent -> shard across v7x's 2 TensorCores.
            dimension_semantics=("parallel",),
            vmem_limit_bytes=vmem_limit,
        ),
        cost_estimate=cost,
    )(x, w1p, b1p, w2p, b2p)


def base_head_split(x, params, *, tb=256):
    """out = head(base(x)) with base = Linear+ReLU, head = Linear.

    `params` comes from prepare_params() (done once, outside the hot path).
    `tb` is the batch tile; sweep {128, 256, 512} for large hidden dims.
    """
    w1p, b1p, w2p, b2p, (F, H, C) = params
    try:
        out = _base_head_call(x, w1p, b1p, w2p, b2p, tb=tb,
                              single_buffer_weights=True)
    except Exception:
        # Fallback if this JAX build rejects single-buffered (Buffered(1))
        # resident-weight blocks: default double-buffering, same numerics.
        out = _base_head_call(x, w1p, b1p, w2p, b2p, tb=tb,
                              single_buffer_weights=False)
    return out[:, :C]


def reference(x, w1, b1, w2, b2):
    # Matches the kernel's numerics: bf16 operands into the MXU, f32
    # accumulation, f32 bias/ReLU epilogue.  (Intentionally not f32-faithful
    # to a pure-f32 PyTorch Linear; document for callers.)
    xb = x.astype(jnp.bfloat16)
    h = jnp.maximum(
        jnp.dot(xb, w1.T.astype(jnp.bfloat16),
                preferred_element_type=jnp.float32) + b1[None, :], 0.0)
    out = jnp.dot(h.astype(jnp.bfloat16), w2.T.astype(jnp.bfloat16),
                  preferred_element_type=jnp.float32) + b2[None, :]
    return out.astype(x.dtype)


if __name__ == "__main__":
    key = jax.random.PRNGKey(0)
    kx, k1, kb1, k2, kb2 = jax.random.split(key, 5)

    B, F, H, C = 8, 32, 64, 16   # batch, in_features, hidden, num_classes

    x = jax.random.normal(kx, (B, F), dtype=jnp.float32)
    # PyTorch Linear layout: weight [out, in], bias [out].
    w1 = jax.random.normal(k1, (H, F), dtype=jnp.float32) * 0.1
    b1 = jax.random.normal(kb1, (H,), dtype=jnp.float32) * 0.1
    w2 = jax.random.normal(k2, (C, H), dtype=jnp.float32) * 0.1
    b2 = jax.random.normal(kb2, (C,), dtype=jnp.float32) * 0.1

    params = prepare_params(w1, b1, w2, b2)       # one-time, out of hot path
    out = base_head_split(x, params)
    out = jax.block_until_ready(out)

    ref = reference(x, w1, b1, w2, b2)
    assert out.shape == (B, C), out.shape
    assert out.dtype == x.dtype, out.dtype
    assert jnp.allclose(out, ref, atol=1e-3, rtol=1e-3), "mismatch vs reference"

    print("KERNEL_OK")
</pallas_src>

<mosaic_0001>
module attributes {stable_mosaic.version = 11 : i64} {
  func.func @base_head_kernel(%arg0: i32, %arg1: memref<8x32xf32, #tpu.memory_space<vmem>>, %arg2: memref<32x128xbf16, #tpu.memory_space<vmem>>, %arg3: memref<1x128xf32, #tpu.memory_space<vmem>>, %arg4: memref<128x128xbf16, #tpu.memory_space<vmem>>, %arg5: memref<1x128xf32, #tpu.memory_space<vmem>>, %arg6: memref<8x128xf32, #tpu.memory_space<vmem>>) attributes {dimension_semantics = [#tpu.dimension_semantics<parallel>], iteration_bounds = array<i64: 1>, scalar_prefetch = 0 : i64, scratch_operands = 0 : i64, tpu.core_type = #tpu.core_type<tc>, window_params = [{transform_indices = @transform_0, window_bounds = array<i64: 8, 32>}, {pipeline_mode = #tpu.pipeline_mode<synchronous>, transform_indices = @transform_1, window_bounds = array<i64: 32, 128>}, {pipeline_mode = #tpu.pipeline_mode<synchronous>, transform_indices = @transform_2, window_bounds = array<i64: 1, 128>}, {pipeline_mode = #tpu.pipeline_mode<synchronous>, transform_indices = @transform_3, window_bounds = array<i64: 128, 128>}, {pipeline_mode = #tpu.pipeline_mode<synchronous>, transform_indices = @transform_4, window_bounds = array<i64: 1, 128>}, {transform_indices = @transform_5, window_bounds = array<i64: 8, 128>}]} {
    %c0 = arith.constant 0 : index
    %c0_0 = arith.constant 0 : index
    %0 = vector.load %arg1[%c0, %c0_0] : memref<8x32xf32, #tpu.memory_space<vmem>>, vector<8x32xf32>
    %1 = arith.truncf %0 : vector<8x32xf32> to vector<8x32xbf16>
    %c0_1 = arith.constant 0 : index
    %c0_2 = arith.constant 0 : index
    %2 = vector.load %arg2[%c0_1, %c0_2] : memref<32x128xbf16, #tpu.memory_space<vmem>>, vector<32x128xbf16>
    %cst = arith.constant dense<0.000000e+00> : vector<8x128xf32>
    %3 = tpu.matmul %1, %2, %cst {dimension_numbers = #tpu.dot_dimension_numbers<[1], [0], [0], [1], [0, 0, 1, 1], [], []>} : vector<8x32xbf16>, vector<32x128xbf16>, vector<8x128xf32> -> vector<8x128xf32>
    %c0_3 = arith.constant 0 : index
    %c0_4 = arith.constant 0 : index
    %4 = vector.load %arg3[%c0_3, %c0_4] : memref<1x128xf32, #tpu.memory_space<vmem>>, vector<1x128xf32>
    %5 = vector.broadcast %4 : vector<1x128xf32> to vector<8x128xf32>
    %6 = arith.addf %3, %5 : vector<8x128xf32>
    %cst_5 = arith.constant 0.000000e+00 : f32
    %7 = vector.broadcast %cst_5 : f32 to vector<8x128xf32>
    %8 = arith.maximumf %6, %7 : vector<8x128xf32>
    %9 = arith.truncf %8 : vector<8x128xf32> to vector<8x128xbf16>
    %c0_6 = arith.constant 0 : index
    %c0_7 = arith.constant 0 : index
    %10 = vector.load %arg4[%c0_6, %c0_7] : memref<128x128xbf16, #tpu.memory_space<vmem>>, vector<128x128xbf16>
    %cst_8 = arith.constant dense<0.000000e+00> : vector<8x128xf32>
    %11 = tpu.matmul %9, %10, %cst_8 {dimension_numbers = #tpu.dot_dimension_numbers<[1], [0], [0], [1], [0, 0, 1, 1], [], []>} : vector<8x128xbf16>, vector<128x128xbf16>, vector<8x128xf32> -> vector<8x128xf32>
    %c0_9 = arith.constant 0 : index
    %c0_10 = arith.constant 0 : index
    %12 = vector.load %arg5[%c0_9, %c0_10] : memref<1x128xf32, #tpu.memory_space<vmem>>, vector<1x128xf32>
    %13 = vector.broadcast %12 : vector<1x128xf32> to vector<8x128xf32>
    %14 = arith.addf %11, %13 : vector<8x128xf32>
    %c0_11 = arith.constant 0 : index
    %c0_12 = arith.constant 0 : index
    %15 = vector.load %arg6[%c0_11, %c0_12] : memref<8x128xf32, #tpu.memory_space<vmem>>, vector<8x128xf32>
    tpu.vector_store %arg6[%c0_11, %c0_12], %14 {strides = array<i32>} : memref<8x128xf32, #tpu.memory_space<vmem>>, vector<8x128xf32>,
    return
  }
  func.func @transform_0(%arg0: i32) -> (i32, i32) {
    %c0_i32 = arith.constant 0 : i32
    %c0_i32_0 = arith.constant 0 : i32
    return %arg0, %c0_i32 : i32, i32
  }
  func.func @transform_1(%arg0: i32) -> (i32, i32) {
    %c0_i32 = arith.constant 0 : i32
    %c0_i32_0 = arith.constant 0 : i32
    %c0_i32_1 = arith.constant 0 : i32
    return %c0_i32, %c0_i32_0 : i32, i32
  }
  func.func @transform_2(%arg0: i32) -> (i32, i32) {
    %c0_i32 = arith.constant 0 : i32
    %c0_i32_0 = arith.constant 0 : i32
    %c0_i32_1 = arith.constant 0 : i32
    return %c0_i32, %c0_i32_0 : i32, i32
  }
  func.func @transform_3(%arg0: i32) -> (i32, i32) {
    %c0_i32 = arith.constant 0 : i32
    %c0_i32_0 = arith.constant 0 : i32
    %c0_i32_1 = arith.constant 0 : i32
    return %c0_i32, %c0_i32_0 : i32, i32
  }
  func.func @transform_4(%arg0: i32) -> (i32, i32) {
    %c0_i32 = arith.constant 0 : i32
    %c0_i32_0 = arith.constant 0 : i32
    %c0_i32_1 = arith.constant 0 : i32
    return %c0_i32, %c0_i32_0 : i32, i32
  }
  func.func @transform_5(%arg0: i32) -> (i32, i32) {
    %c0_i32 = arith.constant 0 : i32
    %c0_i32_0 = arith.constant 0 : i32
    return %arg0, %c0_i32 : i32, i32
  }
}

module attributes {stable_mosaic.version = 11 : i64} {
  func.func @base_head_kernel(%arg0: i32, %arg1: memref<8x32xf32, #tpu.memory_space<vmem>>, %arg2: memref<32x128xbf16, #tpu.memory_space<vmem>>, %arg3: memref<1x128xf32, #tpu.memory_space<vmem>>, %arg4: memref<128x128xbf16, #tpu.memory_space<vmem>>, %arg5: memref<1x128xf32, #tpu.memory_space<vmem>>, %arg6: memref<8x128xf32, #tpu.memory_space<vmem>>) attributes {dimension_semantics = [#tpu.dimension_semantics<parallel>], iteration_bounds = array<i64: 1>, scalar_prefetch = 0 : i64, scratch_operands = 0 : i64, tpu.core_type = #tpu.core_type<tc>, window_params = [{transform_indices = @transform_0, window_bounds = array<i64: 8, 32>}, {pipeline_mode = #tpu.pipeline_mode<synchronous>, transform_indices = @transform_1, window_bounds = array<i64: 32, 128>}, {pipeline_mode = #tpu.pipeline_mode<synchronous>, transform_indices = @transform_2, window_bounds = array<i64: 1, 128>}, {pipeline_mode = #tpu.pipeline_mode<synchronous>, transform_indices = @transform_3, window_bounds = array<i64: 128, 128>}, {pipeline_mode = #tpu.pipeline_mode<synchronous>, transform_indices = @transform_4, window_bounds = array<i64: 1, 128>}, {transform_indices = @transform_5, window_bounds = array<i64: 8, 128>}]} {
    %c0 = arith.constant 0 : index
    %c0_0 = arith.constant 0 : index
    %0 = vector.load %arg1[%c0, %c0_0] : memref<8x32xf32, #tpu.memory_space<vmem>>, vector<8x32xf32>
    %1 = arith.truncf %0 : vector<8x32xf32> to vector<8x32xbf16>
    %c0_1 = arith.constant 0 : index
    %c0_2 = arith.constant 0 : index
    %2 = vector.load %arg2[%c0_1, %c0_2] : memref<32x128xbf16, #tpu.memory_space<vmem>>, vector<32x128xbf16>
    %cst = arith.constant dense<0.000000e+00> : vector<8x128xf32>
    %3 = tpu.matmul %1, %2, %cst {dimension_numbers = #tpu.dot_dimension_numbers<[1], [0], [0], [1], [0, 0, 1, 1], [], []>} : vector<8x32xbf16>, vector<32x128xbf16>, vector<8x128xf32> -> vector<8x128xf32>
    %c0_3 = arith.constant 0 : index
    %c0_4 = arith.constant 0 : index
    %4 = vector.load %arg3[%c0_3, %c0_4] : memref<1x128xf32, #tpu.memory_space<vmem>>, vector<1x128xf32>
    %5 = vector.broadcast %4 : vector<1x128xf32> to vector<8x128xf32>
    %6 = arith.addf %3, %5 : vector<8x128xf32>
    %cst_5 = arith.constant 0.000000e+00 : f32
    %7 = vector.broadcast %cst_5 : f32 to vector<8x128xf32>
    %8 = arith.maximumf %6, %7 : vector<8x128xf32>
    %9 = arith.truncf %8 : vector<8x128xf32> to vector<8x128xbf16>
    %c0_6 = arith.constant 0 : index
    %c0_7 = arith.constant 0 : index
    %10 = vector.load %arg4[%c0_6, %c0_7] : memref<128x128xbf16, #tpu.memory_space<vmem>>, vector<128x128xbf16>
    %cst_8 = arith.constant dense<0.000000e+00> : vector<8x128xf32>
    %11 = tpu.matmul %9, %10, %cst_8 {dimension_numbers = #tpu.dot_dimension_numbers<[1], [0], [0], [1], [0, 0, 1, 1], [], []>} : vector<8x128xbf16>, vector<128x128xbf16>, vector<8x128xf32> -> vector<8x128xf32>
    %c0_9 = arith.constant 0 : index
    %c0_10 = arith.constant 0 : index
    %12 = vector.load %arg5[%c0_9, %c0_10] : memref<1x128xf32, #tpu.memory_space<vmem>>, vector<1x128xf32>
    %13 = vector.broadcast %12 : vector<1x128xf32> to vector<8x128xf32>
    %14 = arith.addf %11, %13 : vector<8x128xf32>
    %c0_11 = arith.constant 0 : index
    %c0_12 = arith.constant 0 : index
    %15 = vector.load %arg6[%c0_11, %c0_12] : memref<8x128xf32, #tpu.memory_space<vmem>>, vector<8x128xf32>
    tpu.vector_store %arg6[%c0_11, %c0_12], %14 {strides = array<i32>} : memref<8x128xf32, #tpu.memory_space<vmem>>, vector<8x128xf32>,
    return
  }
  func.func @transform_0(%arg0: i32) -> (i32, i32) {
    %c0_i32 = arith.constant 0 : i32
    %c0_i32_0 = arith.constant 0 : i32
    return %arg0, %c0_i32 : i32, i32
  }
  func.func @transform_1(%arg0: i32) -> (i32, i32) {
    %c0_i32 = arith.constant 0 : i32
    %c0_i32_0 = arith.constant 0 : i32
    %c0_i32_1 = arith.constant 0 : i32
    return %c0_i32, %c0_i32_0 : i32, i32
  }
  func.func @transform_2(%arg0: i32) -> (i32, i32) {
    %c0_i32 = arith.constant 0 : i32
    %c0_i32_0 = arith.constant 0 : i32
    %c0_i32_1 = arith.constant 0 : i32
    return %c0_i32, %c0_i32_0 : i32, i32
  }
  func.func @transform_3(%arg0: i32) -> (i32, i32) {
    %c0_i32 = arith.constant 0 : i32
    %c0_i32_0 = arith.constant 0 : i32
    %c0_i32_1 = arith.constant 0 : i32
    return %c0_i32, %c0_i32_0 : i32, i32
  }
  func.func @transform_4(%arg0: i32) -> (i32, i32) {
    %c0_i32 = arith.constant 0 : i32
    %c0_i32_0 = arith.constant 0 : i32
    %c0_i32_1 = arith.constant 0 : i32
    return %c0_i32, %c0_i32_0 : i32, i32
  }
  func.func @transform_5(%arg0: i32) -> (i32, i32) {
    %c0_i32 = arith.constant 0 : i32
    %c0_i32_0 = arith.constant 0 : i32
    return %arg0, %c0_i32 : i32, i32
  }
}

</mosaic_0001>

<bundles_post_ra>
// kernel: _base_head_call.1
= control target key start
LH: loop header
LB: loop body
LE: loop exit
PB: predicated region body
PF: predicated region fallthrough
CT: control target
= control target key end

     0   :  { %10 = vsyncpa [#allocation3], 0  ;;  %s423_s0 = inlined_call_operand.hbm [shape: f32[8,32], index: 0, kind: input, shape index: {}]   ;;  %s424_s1 = inlined_call_operand.hbm [shape: bf16[32,128], index: 1, kind: input, shape index: {}]   ;;  %s425_s2 = inlined_call_operand.vmem [shape: f32[1,128], index: 2, kind: input, shape index: {}]   ;;  %s426_s3 = inlined_call_operand.hbm [shape: bf16[128,128], index: 3, kind: input, shape index: {}]   ;;  %s427_s4 = inlined_call_operand.vmem [shape: f32[1,128], index: 4, kind: input, shape index: {}]   ;;  %s428_s5 = inlined_call_operand.hbm [shape: f32[8,128], index: 5, kind: output, shape index: {}]  }
   0x1   :  { %11 = vsyncpa [#allocation6], 0  ;;  %s28_s20 = sshll.u32 %s424_s1, 4  ;;  %s29_s20 = int_to_ptr.hbm [resolvable:$true] %s28_s20 }
   0x2   :  { %12 = vsyncpa [#allocation4], 0  ;;  %s369_s21 = smov [#allocation5]   ;;  %s18_s25 = sshll.u32 %s423_s0, 4  ;;  %s19_s25 = int_to_ptr.hbm [resolvable:$true] %s18_s25 }
   0x3   :  { %s30_s22 = sshll.u32 %s369_s21, 4  ;;  %s370_s26 = smov 64   ;;  %s31_s22 = int_to_ptr.vmem [resolvable:$true] %s30_s22 }
   0x4   :  { %s371_s27 = smov 4   ;;  %s372_s28 = smov [#allocation2]  }
   0x5   :  { %36 = dma.hbm_to_vmem [thread:$0]  %s29_s20, 256, %s31_s22, [#allocation6], %s370_s26, %s370_s26, %s371_s27  }
   0x6   :  { %s20_s29 = sshll.u32 %s372_s28, 4  ;;  %s43_s7 = sshll.u32 %s426_s3, 4  ;;  %s21_s29 = int_to_ptr.vmem [resolvable:$true] %s20_s29  ;;  %s44_s7 = int_to_ptr.hbm [resolvable:$true] %s43_s7 }
   0x7   :  { %23 = dma.hbm_to_vmem [thread:$0]  %s19_s25, 128, %s21_s29, [#allocation3]  }
   0x8   :  { %s373_s1 = smov [#allocation7]  }
   0x9   :  { %s45_s8 = sshll.u32 %s373_s1, 4  ;;  %s46_s8 = int_to_ptr.vmem [resolvable:$true] %s45_s8 }
   0xa   :  { %51 = dma.hbm_to_vmem [thread:$0]  %s44_s7, 1024, %s46_s8, [#allocation6], %s370_s26, %s370_s26, %s371_s27  }
   0xb   :  { %363 = dma.done.wait [#allocation3], 128  }
   0xc   :  { %364 = vsyncadd [#allocation3], 4294967168 }
   0xd   :  { %365 = dma.done.wait [#allocation6], 1280  }
   0xe   :  { %366 = vsyncadd [#allocation6], 4294966016  ;;  %v250_v0 = vld [vmem:[#allocation5 + $0x8] sm:$0xff]  ;;  %v249_v2 = vld [vmem:[#allocation5] sm:$0xff]  ;;  %vm89_vm0 = vcmask 261120   ;;  %s374_s11 = smov [#allocation8]  }
   0xf   :  { %v258_v1 = vld [vmem:[#allocation7 + $0x38] sm:$0xff]  ;;  %99 = vmatpush.bf16.msra.mxu0 %v250_v0  ;;  %v67_v3 = vld [vmem:[#allocation2] sm:$0xff]  ;;  %v257_v4 = vld [vmem:[#allocation7 + $0x30] sm:$0xff]  ;;  %s195_s12 = sshll.u32 %s374_s11, 4  ;;  %s197_s15 = sshll.u32 %s428_s5, 4  ;;  %s196_s12 = int_to_ptr.vmem [resolvable:$true] %s195_s12  ;;  %s198_s15 = int_to_ptr.hbm [resolvable:$true] %s197_s15 }
  0x10   :  { %176 = vmatpush.bf16.msra.mxu1 %v258_v1  ;;  %v68_v5 = vpack.c.bf16 %v67_v3, %v67_v3  ;;  %v256_v6 = vld [vmem:[#allocation7 + $0x28] sm:$0xff]  ;;  %v255_v7 = vld [vmem:[#allocation7 + $0x20] sm:$0xff]  ;;  %v254_v8 = vld [vmem:[#allocation7 + $0x18] sm:$0xff] }
  0x11   :  { %v253_v9 = vld [vmem:[#allocation7 + $0x10] sm:$0xff]  ;;  %v252_v10 = vld [vmem:[#allocation7 + $0x8] sm:$0xff]  ;;  %v251_v11 = vld [vmem:[#allocation7] sm:$0xff] }
  0x12   :  { %v265_v12 = vld [vmem:[%s425_s2] ss:$0 sm:$0xff] }
  0x13   :  { %100 = vmatpush.bf16.msra.mxu0 %v249_v2  ;;  %v266_v18 = vld [vmem:[%s427_s4] ss:$0 sm:$0xff] }
  0x14   :  { %177 = vmatpush.bf16.msra.mxu1 %v257_v4 }
  0x16   :  { %216 = vmatmul.msk.bf16.vlgmr.msra.gmra.mxu0 %vm89_vm0, %v68_v5 }
  0x18   :  { %178 = vmatpush.bf16.msra.mxu1 %v256_v6 }
  0x1c   :  { %179 = vmatpush.bf16.msra.mxu1 %v255_v7 }
  0x20   :  { %180 = vmatpush.bf16.msra.mxu1 %v254_v8 }
  0x24   :  { %181 = vmatpush.bf16.msra.mxu1 %v253_v9 }
  0x28   :  { %182 = vmatpush.bf16.msra.mxu1 %v252_v10 }
  0x2c   :  { %183 = vmatpush.bf16.msra.mxu1 %v251_v11 }
  0x93   :  { %v102_v13 = vpop.f32.mrf.mxu0 }
  0x94   :  { %v103_v14 = vadd.f32 %v265_v12, %v102_v13 }
  0x96   :  { %v106_v15 = vmax.f32 %v103_v14, 0.0 }
  0x98   :  { %v107_v16 = vpack.c.bf16 %v106_v15, %v106_v15 }
  0x9a   :  { %184 = vmatmul.bf16.vlgmr.msra.gmra.mxu1 %v107_v16 }
  0x9b   :  { %v104_v17 = vpop.f32.mrf.mxu0 }
 0x117   :  { %v185_v19 = vpop.f32.mrf.mxu1 }
 0x118   :  { %v186_v20 = vadd.f32 %v266_v18, %v185_v19 }
 0x11a   :  { %189 = vst [vmem:[#allocation8] sm:$0xff] %v186_v20 }
 0x11b   :  { %200 = dma.vmem_to_hbm [thread:$0]  %s196_s12, 128, %s198_s15, [#allocation4]  }
 0x11f   :  { %v187_v21 = vpop.f32.mrf.mxu1 }
 0x120   :  { %367 = dma.done.wait [#allocation4], 128  }
 0x121   :  { %368 = vsyncadd [#allocation4], 4294967168 }
 0x122   :  { %205 = vsyncpa [#allocation3], 1 }
 0x123   :  { %206 = vsyncpa [#allocation6], 1 }
 0x124   :  { %207 = vsyncpa [#allocation4], 1 }

// kernel: _base_head_call.1
= control target key start
LH: loop header
LB: loop body
LE: loop exit
PB: predicated region body
PF: predicated region fallthrough
CT: control target
= control target key end

     0   :  { %10 = vsyncpa [#allocation3], 0  ;;  %s423_s0 = inlined_call_operand.hbm [shape: f32[8,32], index: 0, kind: input, shape index: {}]   ;;  %s424_s1 = inlined_call_operand.hbm [shape: bf16[32,128], index: 1, kind: input, shape index: {}]   ;;  %s425_s2 = inlined_call_operand.vmem [shape: f32[1,128], index: 2, kind: input, shape index: {}]   ;;  %s426_s3 = inlined_call_operand.hbm [shape: bf16[128,128], index: 3, kind: input, shape index: {}]   ;;  %s427_s4 = inlined_call_operand.vmem [shape: f32[1,128], index: 4, kind: input, shape index: {}]   ;;  %s428_s5 = inlined_call_operand.hbm [shape: f32[8,128], index: 5, kind: output, shape index: {}]  }
   0x1   :  { %11 = vsyncpa [#allocation6], 0  ;;  %s28_s20 = sshll.u32 %s424_s1, 4  ;;  %s29_s20 = int_to_ptr.hbm [resolvable:$true] %s28_s20 }
   0x2   :  { %12 = vsyncpa [#allocation4], 0  ;;  %s369_s21 = smov [#allocation5]   ;;  %s18_s25 = sshll.u32 %s423_s0, 4  ;;  %s19_s25 = int_to_ptr.hbm [resolvable:$true] %s18_s25 }
   0x3   :  { %s30_s22 = sshll.u32 %s369_s21, 4  ;;  %s370_s26 = smov 64   ;;  %s31_s22 = int_to_ptr.vmem [resolvable:$true] %s30_s22 }
   0x4   :  { %s371_s27 = smov 4   ;;  %s372_s28 = smov [#allocation2]  }
   0x5   :  { %36 = dma.hbm_to_vmem [thread:$0]  %s29_s20, 256, %s31_s22, [#allocation6], %s370_s26, %s370_s26, %s371_s27  }
   0x6   :  { %s20_s29 = sshll.u32 %s372_s28, 4  ;;  %s43_s7 = sshll.u32 %s426_s3, 4  ;;  %s21_s29 = int_to_ptr.vmem [resolvable:$true] %s20_s29  ;;  %s44_s7 = int_to_ptr.hbm [resolvable:$true] %s43_s7 }
   0x7   :  { %23 = dma.hbm_to_vmem [thread:$0]  %s19_s25, 128, %s21_s29, [#allocation3]  }
   0x8   :  { %s373_s1 = smov [#allocation7]  }
   0x9   :  { %s45_s8 = sshll.u32 %s373_s1, 4  ;;  %s46_s8 = int_to_ptr.vmem [resolvable:$true] %s45_s8 }
   0xa   :  { %51 = dma.hbm_to_vmem [thread:$0]  %s44_s7, 1024, %s46_s8, [#allocation6], %s370_s26, %s370_s26, %s371_s27  }
   0xb   :  { %363 = dma.done.wait [#allocation3], 128  }
   0xc   :  { %364 = vsyncadd [#allocation3], 4294967168 }
   0xd   :  { %365 = dma.done.wait [#allocation6], 1280  }
   0xe   :  { %366 = vsyncadd [#allocation6], 4294966016  ;;  %v250_v0 = vld [vmem:[#allocation5 + $0x8] sm:$0xff]  ;;  %v249_v2 = vld [vmem:[#allocation5] sm:$0xff]  ;;  %vm89_vm0 = vcmask 261120   ;;  %s374_s11 = smov [#allocation8]  }
   0xf   :  { %v258_v1 = vld [vmem:[#allocation7 + $0x38] sm:$0xff]  ;;  %99 = vmatpush.bf16.msra.mxu0 %v250_v0  ;;  %v67_v3 = vld [vmem:[#allocation2] sm:$0xff]  ;;  %v257_v4 = vld [vmem:[#allocation7 + $0x30] sm:$0xff]  ;;  %s195_s12 = sshll.u32 %s374_s11, 4  ;;  %s197_s15 = sshll.u32 %s428_s5, 4  ;;  %s196_s12 = int_to_ptr.vmem [resolvable:$true] %s195_s12  ;;  %s198_s15 = int_to_ptr.hbm [resolvable:$true] %s197_s15 }
  0x10   :  { %176 = vmatpush.bf16.msra.mxu1 %v258_v1  ;;  %v68_v5 = vpack.c.bf16 %v67_v3, %v67_v3  ;;  %v256_v6 = vld [vmem:[#allocation7 + $0x28] sm:$0xff]  ;;  %v255_v7 = vld [vmem:[#allocation7 + $0x20] sm:$0xff]  ;;  %v254_v8 = vld [vmem:[#allocation7 + $0x18] sm:$0xff] }
  0x11   :  { %v253_v9 = vld [vmem:[#allocation7 + $0x10] sm:$0xff]  ;;  %v252_v10 = vld [vmem:[#allocation7 + $0x8] sm:$0xff]  ;;  %v251_v11 = vld [vmem:[#allocation7] sm:$0xff] }
  0x12   :  { %v265_v12 = vld [vmem:[%s425_s2] ss:$0 sm:$0xff] }
  0x13   :  { %100 = vmatpush.bf16.msra.mxu0 %v249_v2  ;;  %v266_v18 = vld [vmem:[%s427_s4] ss:$0 sm:$0xff] }
  0x14   :  { %177 = vmatpush.bf16.msra.mxu1 %v257_v4 }
  0x16   :  { %216 = vmatmul.msk.bf16.vlgmr.msra.gmra.mxu0 %vm89_vm0, %v68_v5 }
  0x18   :  { %178 = vmatpush.bf16.msra.mxu1 %v256_v6 }
  0x1c   :  { %179 = vmatpush.bf16.msra.mxu1 %v255_v7 }
  0x20   :  { %180 = vmatpush.bf16.msra.mxu1 %v254_v8 }
  0x24   :  { %181 = vmatpush.bf16.msra.mxu1 %v253_v9 }
  0x28   :  { %182 = vmatpush.bf16.msra.mxu1 %v252_v10 }
  0x2c   :  { %183 = vmatpush.bf16.msra.mxu1 %v251_v11 }
  0x93   :  { %v102_v13 = vpop.f32.mrf.mxu0 }
  0x94   :  { %v103_v14 = vadd.f32 %v265_v12, %v102_v13 }
  0x96   :  { %v106_v15 = vmax.f32 %v103_v14, 0.0 }
  0x98   :  { %v107_v16 = vpack.c.bf16 %v106_v15, %v106_v15 }
  0x9a   :  { %184 = vmatmul.bf16.vlgmr.msra.gmra.mxu1 %v107_v16 }
  0x9b   :  { %v104_v17 = vpop.f32.mrf.mxu0 }
 0x117   :  { %v185_v19 = vpop.f32.mrf.mxu1 }
 0x118   :  { %v186_v20 = vadd.f32 %v266_v18, %v185_v19 }
 0x11a   :  { %189 = vst [vmem:[#allocation8] sm:$0xff] %v186_v20 }
 0x11b   :  { %200 = dma.vmem_to_hbm [thread:$0]  %s196_s12, 128, %s198_s15, [#allocation4]  }
 0x11f   :  { %v187_v21 = vpop.f32.mrf.mxu1 }
 0x120   :  { %367 = dma.done.wait [#allocation4], 128  }
 0x121   :  { %368 = vsyncadd [#allocation4], 4294967168 }
 0x122   :  { %205 = vsyncpa [#allocation3], 1 }
 0x123   :  { %206 = vsyncpa [#allocation6], 1 }
 0x124   :  { %207 = vsyncpa [#allocation4], 1 }

</bundles_post_ra>
